<compile_context>
chip_gen: v5e
topology: v5e:2x2
jax: 0.10.0
libtpu: 0.0.40
codegen_flags: <defaults>
</compile_context>

<pallas_src>
import functools

import jax
import jax.numpy as jnp
from jax import lax
from jax.experimental import pallas as pl
from jax.experimental.pallas import tpu as pltpu

EPS = 1e-5
NEG_SLOPE = 0.2


def _cnn_block_kernel(xq_ref, w_ref, gamma_ref, beta_ref, out_ref,
                      sum_ref, sq_ref, *, Ho, Wo, KP, C_out, TH):
    # xq_ref:     (Hh*KP, Wh)      bf16  phase-split sample, resident across the t axis
    # w_ref:      (2*C_out, 2*KP)  bf16  fused tap slab, resident
    # gamma/beta: (C_out, 1)       f32
    # out_ref:    (Ho, C_out, Wo)  bf16  per-sample resident output (raw conv until finalize)
    # sum_ref/sq_ref: (C_out, Wo)  f32   full-width running sum / sum of squares
    t = pl.program_id(1)

    @pl.when(t == 0)
    def _init():
        sum_ref[...] = jnp.zeros_like(sum_ref)
        sq_ref[...] = jnp.zeros_like(sq_ref)

    w = w_ref[...]                              # hoisted out of the row loop
    base = t * TH
    align = KP & -KP                            # largest power-of-two divisor of KP

    # TH output rows per grid step (static unroll; TH is small).
    for r in range(TH):
        ho = base + r

        @pl.when(ho < Ho)                       # guard for a partial last block
        def _row():
            start = pl.multiple_of(ho * KP, align)
            x2 = xq_ref[pl.ds(start, 2 * KP), :]             # (2*KP, Wh) bf16, contiguous
            # Single fused MXU push per row, contraction depth 2*KP = 8*Cin.
            rmat = jnp.dot(w, x2, preferred_element_type=jnp.float32)   # (2*C_out, Wh) f32
            lo = rmat[:C_out, :]                             # dw = 0 taps
            hi = rmat[C_out:, :]                             # dw = 1 taps
            # y[:, j] = lo[:, j] + hi[:, j+1]; the 1-lane shift is done on the f32 result so the
            # MXU operands stay lane-aligned (equivalent to a roll-by--1 + slice, minus wraparound).
            acc = lo[:, :Wo] + hi[:, 1:1 + Wo]               # (C_out, Wo) f32
            out_ref[ho] = acc.astype(out_ref.dtype)          # stash raw conv row (bf16)
            # Deferred instance-norm stats: plain VPU adds, no per-step cross-lane reduce.
            sum_ref[...] += acc
            sq_ref[...] += acc * acc

    @pl.when(t == pl.num_programs(1) - 1)
    def _finalize():
        inv_cnt = 1.0 / float(Ho * Wo)
        mean = jnp.sum(sum_ref[...], axis=1, keepdims=True) * inv_cnt    # (C_out, 1)
        ex2 = jnp.sum(sq_ref[...], axis=1, keepdims=True) * inv_cnt
        # TODO(synk): E[x^2]-E[x]^2 in f32 can cancel when the conv mean is large vs its std; if this
        #             feeds training, accumulate the second moment around a per-channel reference value.
        var = jnp.maximum(ex2 - mean * mean, 0.0)
        rstd = lax.rsqrt(var + EPS)
        scale = gamma_ref[...] * rstd                        # (C_out, 1)
        shift = beta_ref[...] - mean * scale
        y = out_ref[...].astype(jnp.float32)                 # (Ho, C_out, Wo) raw conv
        z = y * scale + shift                                # (C_out, 1) broadcasts over rows / lanes
        out_ref[...] = jnp.where(z >= 0.0, z, NEG_SLOPE * z).astype(out_ref.dtype)


@jax.jit
def cnn_block_forward(x, weight, gamma, beta):
    """x: (N, C_in, H, W) NCHW; weight: (C_out, C_in, 4, 4); gamma/beta: (C_out,). stride = 2."""
    N, C, H, W = x.shape
    C_out = weight.shape[0]
    assert weight.shape == (C_out, C, 4, 4)
    assert H % 2 == 0 and W % 2 == 0 and H >= 4 and W >= 4
    Hh, Wh = H // 2, W // 2
    Ho, Wo = Hh - 1, Wh - 1          # valid conv, k=4, stride=2
    KP = 4 * C                       # per-phase contraction block: (ph, pw, c)

    TH = min(8, Ho)                  # output rows per grid step
    NT = pl.cdiv(Ho, TH)

    xb = x.astype(jnp.bfloat16)
    wb = weight.astype(jnp.bfloat16)

    # Phase-split relayout (1x size, no im2col):
    #   xq[n, i*KP + (ph*2+pw)*C + c, j] = x[n, c, 2i+ph, 2j+pw]
    xq = (xb.reshape(N, C, Hh, 2, Wh, 2)         # (n, c, i, ph, j, pw)
            .transpose(0, 2, 3, 5, 1, 4)         # (n, i, ph, pw, c, j)
            .reshape(N, Hh * KP, Wh))
    # Fused tap slab:
    #   w2[dw*C_out + co, dh*KP + (ph*2+pw)*C + c] = weight[co, c, 2*dh+ph, 2*dw+pw]
    w2 = (wb.reshape(C_out, C, 2, 2, 2, 2)       # (co, c, dh, ph, dw, pw)
            .transpose(4, 0, 2, 3, 5, 1)         # (dw, co, dh, ph, pw, c)
            .reshape(2 * C_out, 2 * KP))

    gamma2 = gamma.reshape(C_out, 1).astype(jnp.float32)
    beta2 = beta.reshape(C_out, 1).astype(jnp.float32)

    kernel = functools.partial(_cnn_block_kernel, Ho=Ho, Wo=Wo, KP=KP, C_out=C_out, TH=TH)

    out_nhcw = pl.pallas_call(
        kernel,
        out_shape=jax.ShapeDtypeStruct((N, Ho, C_out, Wo), jnp.bfloat16),
        grid_spec=pltpu.PrefetchScalarGridSpec(
            num_scalar_prefetch=0,
            grid=(N, NT),
            in_specs=[
                pl.BlockSpec((None, Hh * KP, Wh), lambda n, t: (n, 0, 0)),   # x sample, resident
                pl.BlockSpec((2 * C_out, 2 * KP), lambda n, t: (0, 0)),      # fused weights, resident
                pl.BlockSpec((C_out, 1), lambda n, t: (0, 0)),               # gamma
                pl.BlockSpec((C_out, 1), lambda n, t: (0, 0)),               # beta
            ],
            out_specs=pl.BlockSpec((None, Ho, C_out, Wo), lambda n, t: (n, 0, 0, 0)),
            scratch_shapes=[
                pltpu.VMEM((C_out, Wo), jnp.float32),   # running sum  (full-width)
                pltpu.VMEM((C_out, Wo), jnp.float32),   # running sum of squares (full-width)
            ],
        ),
        compiler_params=pltpu.CompilerParams(
            dimension_semantics=("parallel", "arbitrary"),
            vmem_limit_bytes=32 * 1024 * 1024,
        ),
    )(xq, w2, gamma2, beta2)

    # (N, Ho, Cout, Wo) bf16 -> NCHW f32 (transpose + convert fuse into one XLA copy).
    return jnp.transpose(out_nhcw, (0, 2, 1, 3)).astype(jnp.float32)


def reference_forward(x, weight, gamma, beta, stride=2):
    y = lax.conv_general_dilated(
        x, weight, window_strides=(stride, stride), padding="VALID",
        dimension_numbers=("NCHW", "OIHW", "NCHW"),
        precision=lax.Precision.HIGHEST)
    mean = jnp.mean(y, axis=(2, 3), keepdims=True)
    var = jnp.mean((y - mean) ** 2, axis=(2, 3), keepdims=True)
    y_hat = (y - mean) * lax.rsqrt(var + EPS)
    z = y_hat * gamma.reshape(1, -1, 1, 1) + beta.reshape(1, -1, 1, 1)
    return jnp.where(z >= 0, z, NEG_SLOPE * z)


if __name__ == "__main__":
    key = jax.random.PRNGKey(0)
    kx, kw, kg, kb = jax.random.split(key, 4)

    N, C_in, H, W = 2, 4, 16, 16
    C_out, ksize, stride = 8, 4, 2

    x = jax.random.normal(kx, (N, C_in, H, W), dtype=jnp.float32)
    weight = jax.random.normal(kw, (C_out, C_in, ksize, ksize), dtype=jnp.float32) * 0.1
    # InstanceNorm2d(affine=True) parameters (perturbed from default init to exercise the affine path).
    gamma = 1.0 + 0.1 * jax.random.normal(kg, (C_out,), dtype=jnp.float32)
    beta = 0.1 * jax.random.normal(kb, (C_out,), dtype=jnp.float32)

    out = cnn_block_forward(x, weight, gamma, beta)
    out = jax.block_until_ready(out)
    assert out.shape == (N, C_out, 7, 7), out.shape

    # Reference built from the same bf16-quantized operands the kernel consumes (f32 math otherwise).
    # Tolerance accounts for the bf16 storage of the conv / activation values inside the kernel.
    x_q = x.astype(jnp.bfloat16).astype(jnp.float32)
    w_q = weight.astype(jnp.bfloat16).astype(jnp.float32)
    ref = reference_forward(x_q, w_q, gamma, beta, stride=stride)
    max_err = float(jnp.max(jnp.abs(out - ref)))
    assert jnp.allclose(out, ref, atol=5e-2, rtol=5e-2), ("mismatch vs reference", max_err)

    print("KERNEL_OK")
</pallas_src>

<mosaic_0001>
module attributes {stable_mosaic.version = 11 : i64} {
  func.func @_cnn_block_kernel(%arg0: i32, %arg1: i32, %arg2: memref<1x128x8xbf16, #tpu.memory_space<vmem>>, %arg3: memref<16x32xbf16, #tpu.memory_space<vmem>>, %arg4: memref<8x1xf32, #tpu.memory_space<vmem>>, %arg5: memref<8x1xf32, #tpu.memory_space<vmem>>, %arg6: memref<1x7x8x7xbf16, #tpu.memory_space<vmem>>, %arg7: memref<8x7xf32, #tpu.memory_space<vmem>>, %arg8: memref<8x7xf32, #tpu.memory_space<vmem>>) attributes {dimension_semantics = [#tpu.dimension_semantics<parallel>, #tpu.dimension_semantics<arbitrary>], iteration_bounds = array<i64: 2, 1>, scalar_prefetch = 0 : i64, scratch_operands = 2 : i64, tpu.core_type = #tpu.core_type<tc>, window_params = [{transform_indices = @transform_0, window_bounds = array<i64: 1, 128, 8>}, {pipeline_mode = #tpu.pipeline_mode<synchronous>, transform_indices = @transform_1, window_bounds = array<i64: 16, 32>}, {pipeline_mode = #tpu.pipeline_mode<synchronous>, transform_indices = @transform_2, window_bounds = array<i64: 8, 1>}, {pipeline_mode = #tpu.pipeline_mode<synchronous>, transform_indices = @transform_3, window_bounds = array<i64: 8, 1>}, {transform_indices = @transform_4, window_bounds = array<i64: 1, 7, 8, 7>}]} {
    %c0_i32 = arith.constant 0 : i32
    %0 = arith.cmpi eq, %arg1, %c0_i32 : i32
    %1 = arith.extui %0 : i1 to i32
    %c0_i32_0 = arith.constant 0 : i32
    %2 = arith.cmpi ne, %1, %c0_i32_0 : i32
    scf.if %2 {
      %cst = arith.constant 0.000000e+00 : f32
      %36 = vector.broadcast %cst : f32 to vector<8x7xf32>
      %c0_19 = arith.constant 0 : index
      %c0_20 = arith.constant 0 : index
      %37 = vector.load %arg7[%c0_19, %c0_20] : memref<8x7xf32, #tpu.memory_space<vmem>>, vector<8x7xf32>
      tpu.vector_store %arg7[%c0_19, %c0_20], %36 {strides = array<i32>} : memref<8x7xf32, #tpu.memory_space<vmem>>, vector<8x7xf32>,
      %cst_21 = arith.constant 0.000000e+00 : f32
      %38 = vector.broadcast %cst_21 : f32 to vector<8x7xf32>
      %c0_22 = arith.constant 0 : index
      %c0_23 = arith.constant 0 : index
      %39 = vector.load %arg8[%c0_22, %c0_23] : memref<8x7xf32, #tpu.memory_space<vmem>>, vector<8x7xf32>
      tpu.vector_store %arg8[%c0_22, %c0_23], %38 {strides = array<i32>} : memref<8x7xf32, #tpu.memory_space<vmem>>, vector<8x7xf32>,
    } else {
    }
    %c0 = arith.constant 0 : index
    %c0_1 = arith.constant 0 : index
    %3 = vector.load %arg3[%c0, %c0_1] : memref<16x32xbf16, #tpu.memory_space<vmem>>, vector<16x32xbf16>
    %c7_i32 = arith.constant 7 : i32
    %4 = arith.muli %arg1, %c7_i32 : i32
    %c0_i32_2 = arith.constant 0 : i32
    %5 = arith.addi %4, %c0_i32_2 : i32
    %c7_i32_3 = arith.constant 7 : i32
    %6 = arith.cmpi slt, %5, %c7_i32_3 : i32
    %7 = arith.extui %6 : i1 to i32
    %c0_i32_4 = arith.constant 0 : i32
    %8 = arith.cmpi ne, %7, %c0_i32_4 : i32
    scf.if %8 {
      %c16_i32 = arith.constant 16 : i32
      %36 = arith.muli %5, %c16_i32 : i32
      %37 = tpu.assume_multiple %36, 16 : i32
      %c0_19 = arith.constant 0 : index
      %38 = arith.index_cast %37 : i32 to index
      %c0_20 = arith.constant 0 : index
      %39 = vector.load %arg2[%c0_19, %38, %c0_20] : memref<1x128x8xbf16, #tpu.memory_space<vmem>>, vector<1x32x8xbf16>
      %40 = vector.shape_cast %39 : vector<1x32x8xbf16> to vector<32x8xbf16>
      %cst = arith.constant dense<0.000000e+00> : vector<16x8xf32>
      %41 = tpu.matmul %3, %40, %cst {dimension_numbers = #tpu.dot_dimension_numbers<[1], [0], [0], [1], [0, 0, 1, 1], [], []>} : vector<16x32xbf16>, vector<32x8xbf16>, vector<16x8xf32> -> vector<16x8xf32>
      %42 = vector.extract_strided_slice %41 {offsets = [0, 0], sizes = [8, 8], strides = [1, 1]} : vector<16x8xf32> to vector<8x8xf32>
      %43 = vector.extract_strided_slice %41 {offsets = [8, 0], sizes = [8, 8], strides = [1, 1]} : vector<16x8xf32> to vector<8x8xf32>
      %44 = vector.extract_strided_slice %42 {offsets = [0, 0], sizes = [8, 7], strides = [1, 1]} : vector<8x8xf32> to vector<8x7xf32>
      %45 = vector.extract_strided_slice %43 {offsets = [0, 1], sizes = [8, 7], strides = [1, 1]} : vector<8x8xf32> to vector<8x7xf32>
      %46 = arith.addf %44, %45 : vector<8x7xf32>
      %47 = arith.truncf %46 : vector<8x7xf32> to vector<8x7xbf16>
      %c0_21 = arith.constant 0 : index
      %48 = arith.index_cast %5 : i32 to index
      %c0_22 = arith.constant 0 : index
      %c0_23 = arith.constant 0 : index
      %49 = vector.load %arg6[%c0_21, %48, %c0_22, %c0_23] : memref<1x7x8x7xbf16, #tpu.memory_space<vmem>>, vector<1x1x8x7xbf16>
      %50 = vector.shape_cast %49 : vector<1x1x8x7xbf16> to vector<8x7xbf16>
      %51 = vector.shape_cast %47 : vector<8x7xbf16> to vector<1x1x8x7xbf16>
      tpu.vector_store %arg6[%c0_21, %48, %c0_22, %c0_23], %51 {strides = array<i32>} : memref<1x7x8x7xbf16, #tpu.memory_space<vmem>>, vector<1x1x8x7xbf16>,
      %c0_24 = arith.constant 0 : index
      %c0_25 = arith.constant 0 : index
      %52 = vector.load %arg7[%c0_24, %c0_25] : memref<8x7xf32, #tpu.memory_space<vmem>>, vector<8x7xf32>
      %53 = arith.addf %52, %46 : vector<8x7xf32>
      %c0_26 = arith.constant 0 : index
      %c0_27 = arith.constant 0 : index
      %54 = vector.load %arg7[%c0_26, %c0_27] : memref<8x7xf32, #tpu.memory_space<vmem>>, vector<8x7xf32>
      tpu.vector_store %arg7[%c0_26, %c0_27], %53 {strides = array<i32>} : memref<8x7xf32, #tpu.memory_space<vmem>>, vector<8x7xf32>,
      %c0_28 = arith.constant 0 : index
      %c0_29 = arith.constant 0 : index
      %55 = vector.load %arg8[%c0_28, %c0_29] : memref<8x7xf32, #tpu.memory_space<vmem>>, vector<8x7xf32>
      %56 = arith.mulf %46, %46 : vector<8x7xf32>
      %57 = arith.addf %55, %56 : vector<8x7xf32>
      %c0_30 = arith.constant 0 : index
      %c0_31 = arith.constant 0 : index
      %58 = vector.load %arg8[%c0_30, %c0_31] : memref<8x7xf32, #tpu.memory_space<vmem>>, vector<8x7xf32>
      tpu.vector_store %arg8[%c0_30, %c0_31], %57 {strides = array<i32>} : memref<8x7xf32, #tpu.memory_space<vmem>>, vector<8x7xf32>,
    } else {
    }
    %c1_i32 = arith.constant 1 : i32
    %9 = arith.addi %4, %c1_i32 : i32
    %c7_i32_5 = arith.constant 7 : i32
    %10 = arith.cmpi slt, %9, %c7_i32_5 : i32
    %11 = arith.extui %10 : i1 to i32
    %c0_i32_6 = arith.constant 0 : i32
    %12 = arith.cmpi ne, %11, %c0_i32_6 : i32
    scf.if %12 {
      %c16_i32 = arith.constant 16 : i32
      %36 = arith.muli %9, %c16_i32 : i32
      %37 = tpu.assume_multiple %36, 16 : i32
      %c0_19 = arith.constant 0 : index
      %38 = arith.index_cast %37 : i32 to index
      %c0_20 = arith.constant 0 : index
      %39 = vector.load %arg2[%c0_19, %38, %c0_20] : memref<1x128x8xbf16, #tpu.memory_space<vmem>>, vector<1x32x8xbf16>
      %40 = vector.shape_cast %39 : vector<1x32x8xbf16> to vector<32x8xbf16>
      %cst = arith.constant dense<0.000000e+00> : vector<16x8xf32>
      %41 = tpu.matmul %3, %40, %cst {dimension_numbers = #tpu.dot_dimension_numbers<[1], [0], [0], [1], [0, 0, 1, 1], [], []>} : vector<16x32xbf16>, vector<32x8xbf16>, vector<16x8xf32> -> vector<16x8xf32>
      %42 = vector.extract_strided_slice %41 {offsets = [0, 0], sizes = [8, 8], strides = [1, 1]} : vector<16x8xf32> to vector<8x8xf32>
      %43 = vector.extract_strided_slice %41 {offsets = [8, 0], sizes = [8, 8], strides = [1, 1]} : vector<16x8xf32> to vector<8x8xf32>
      %44 = vector.extract_strided_slice %42 {offsets = [0, 0], sizes = [8, 7], strides = [1, 1]} : vector<8x8xf32> to vector<8x7xf32>
      %45 = vector.extract_strided_slice %43 {offsets = [0, 1], sizes = [8, 7], strides = [1, 1]} : vector<8x8xf32> to vector<8x7xf32>
      %46 = arith.addf %44, %45 : vector<8x7xf32>
      %47 = arith.truncf %46 : vector<8x7xf32> to vector<8x7xbf16>
      %c0_21 = arith.constant 0 : index
      %48 = arith.index_cast %9 : i32 to index
      %c0_22 = arith.constant 0 : index
      %c0_23 = arith.constant 0 : index
      %49 = vector.load %arg6[%c0_21, %48, %c0_22, %c0_23] : memref<1x7x8x7xbf16, #tpu.memory_space<vmem>>, vector<1x1x8x7xbf16>
      %50 = vector.shape_cast %49 : vector<1x1x8x7xbf16> to vector<8x7xbf16>
      %51 = vector.shape_cast %47 : vector<8x7xbf16> to vector<1x1x8x7xbf16>
      tpu.vector_store %arg6[%c0_21, %48, %c0_22, %c0_23], %51 {strides = array<i32>} : memref<1x7x8x7xbf16, #tpu.memory_space<vmem>>, vector<1x1x8x7xbf16>,
      %c0_24 = arith.constant 0 : index
      %c0_25 = arith.constant 0 : index
      %52 = vector.load %arg7[%c0_24, %c0_25] : memref<8x7xf32, #tpu.memory_space<vmem>>, vector<8x7xf32>
      %53 = arith.addf %52, %46 : vector<8x7xf32>
      %c0_26 = arith.constant 0 : index
      %c0_27 = arith.constant 0 : index
      %54 = vector.load %arg7[%c0_26, %c0_27] : memref<8x7xf32, #tpu.memory_space<vmem>>, vector<8x7xf32>
      tpu.vector_store %arg7[%c0_26, %c0_27], %53 {strides = array<i32>} : memref<8x7xf32, #tpu.memory_space<vmem>>, vector<8x7xf32>,
      %c0_28 = arith.constant 0 : index
      %c0_29 = arith.constant 0 : index
      %55 = vector.load %arg8[%c0_28, %c0_29] : memref<8x7xf32, #tpu.memory_space<vmem>>, vector<8x7xf32>
      %56 = arith.mulf %46, %46 : vector<8x7xf32>
      %57 = arith.addf %55, %56 : vector<8x7xf32>
      %c0_30 = arith.constant 0 : index
      %c0_31 = arith.constant 0 : index
      %58 = vector.load %arg8[%c0_30, %c0_31] : memref<8x7xf32, #tpu.memory_space<vmem>>, vector<8x7xf32>
      tpu.vector_store %arg8[%c0_30, %c0_31], %57 {strides = array<i32>} : memref<8x7xf32, #tpu.memory_space<vmem>>, vector<8x7xf32>,
    } else {
    }
    %c2_i32 = arith.constant 2 : i32
    %13 = arith.addi %4, %c2_i32 : i32
    %c7_i32_7 = arith.constant 7 : i32
    %14 = arith.cmpi slt, %13, %c7_i32_7 : i32
    %15 = arith.extui %14 : i1 to i32
    %c0_i32_8 = arith.constant 0 : i32
    %16 = arith.cmpi ne, %15, %c0_i32_8 : i32
    scf.if %16 {
      %c16_i32 = arith.constant 16 : i32
      %36 = arith.muli %13, %c16_i32 : i32
      %37 = tpu.assume_multiple %36, 16 : i32
      %c0_19 = arith.constant 0 : index
      %38 = arith.index_cast %37 : i32 to index
      %c0_20 = arith.constant 0 : index
      %39 = vector.load %arg2[%c0_19, %38, %c0_20] : memref<1x128x8xbf16, #tpu.memory_space<vmem>>, vector<1x32x8xbf16>
      %40 = vector.shape_cast %39 : vector<1x32x8xbf16> to vector<32x8xbf16>
      %cst = arith.constant dense<0.000000e+00> : vector<16x8xf32>
      %41 = tpu.matmul %3, %40, %cst {dimension_numbers = #tpu.dot_dimension_numbers<[1], [0], [0], [1], [0, 0, 1, 1], [], []>} : vector<16x32xbf16>, vector<32x8xbf16>, vector<16x8xf32> -> vector<16x8xf32>
      %42 = vector.extract_strided_slice %41 {offsets = [0, 0], sizes = [8, 8], strides = [1, 1]} : vector<16x8xf32> to vector<8x8xf32>
      %43 = vector.extract_strided_slice %41 {offsets = [8, 0], sizes = [8, 8], strides = [1, 1]} : vector<16x8xf32> to vector<8x8xf32>
      %44 = vector.extract_strided_slice %42 {offsets = [0, 0], sizes = [8, 7], strides = [1, 1]} : vector<8x8xf32> to vector<8x7xf32>
      %45 = vector.extract_strided_slice %43 {offsets = [0, 1], sizes = [8, 7], strides = [1, 1]} : vector<8x8xf32> to vector<8x7xf32>
      %46 = arith.addf %44, %45 : vector<8x7xf32>
      %47 = arith.truncf %46 : vector<8x7xf32> to vector<8x7xbf16>
      %c0_21 = arith.constant 0 : index
      %48 = arith.index_cast %13 : i32 to index
      %c0_22 = arith.constant 0 : index
      %c0_23 = arith.constant 0 : index
      %49 = vector.load %arg6[%c0_21, %48, %c0_22, %c0_23] : memref<1x7x8x7xbf16, #tpu.memory_space<vmem>>, vector<1x1x8x7xbf16>
      %50 = vector.shape_cast %49 : vector<1x1x8x7xbf16> to vector<8x7xbf16>
      %51 = vector.shape_cast %47 : vector<8x7xbf16> to vector<1x1x8x7xbf16>
      tpu.vector_store %arg6[%c0_21, %48, %c0_22, %c0_23], %51 {strides = array<i32>} : memref<1x7x8x7xbf16, #tpu.memory_space<vmem>>, vector<1x1x8x7xbf16>,
      %c0_24 = arith.constant 0 : index
      %c0_25 = arith.constant 0 : index
      %52 = vector.load %arg7[%c0_24, %c0_25] : memref<8x7xf32, #tpu.memory_space<vmem>>, vector<8x7xf32>
      %53 = arith.addf %52, %46 : vector<8x7xf32>
      %c0_26 = arith.constant 0 : index
      %c0_27 = arith.constant 0 : index
      %54 = vector.load %arg7[%c0_26, %c0_27] : memref<8x7xf32, #tpu.memory_space<vmem>>, vector<8x7xf32>
      tpu.vector_store %arg7[%c0_26, %c0_27], %53 {strides = array<i32>} : memref<8x7xf32, #tpu.memory_space<vmem>>, vector<8x7xf32>,
      %c0_28 = arith.constant 0 : index
      %c0_29 = arith.constant 0 : index
      %55 = vector.load %arg8[%c0_28, %c0_29] : memref<8x7xf32, #tpu.memory_space<vmem>>, vector<8x7xf32>
      %56 = arith.mulf %46, %46 : vector<8x7xf32>
      %57 = arith.addf %55, %56 : vector<8x7xf32>
      %c0_30 = arith.constant 0 : index
      %c0_31 = arith.constant 0 : index
      %58 = vector.load %arg8[%c0_30, %c0_31] : memref<8x7xf32, #tpu.memory_space<vmem>>, vector<8x7xf32>
      tpu.vector_store %arg8[%c0_30, %c0_31], %57 {strides = array<i32>} : memref<8x7xf32, #tpu.memory_space<vmem>>, vector<8x7xf32>,
    } else {
    }
    %c3_i32 = arith.constant 3 : i32
    %17 = arith.addi %4, %c3_i32 : i32
    %c7_i32_9 = arith.constant 7 : i32
    %18 = arith.cmpi slt, %17, %c7_i32_9 : i32
    %19 = arith.extui %18 : i1 to i32
    %c0_i32_10 = arith.constant 0 : i32
    %20 = arith.cmpi ne, %19, %c0_i32_10 : i32
    scf.if %20 {
      %c16_i32 = arith.constant 16 : i32
      %36 = arith.muli %17, %c16_i32 : i32
      %37 = tpu.assume_multiple %36, 16 : i32
      %c0_19 = arith.constant 0 : index
      %38 = arith.index_cast %37 : i32 to index
      %c0_20 = arith.constant 0 : index
      %39 = vector.load %arg2[%c0_19, %38, %c0_20] : memref<1x128x8xbf16, #tpu.memory_space<vmem>>, vector<1x32x8xbf16>
      %40 = vector.shape_cast %39 : vector<1x32x8xbf16> to vector<32x8xbf16>
      %cst = arith.constant dense<0.000000e+00> : vector<16x8xf32>
      %41 = tpu.matmul %3, %40, %cst {dimension_numbers = #tpu.dot_dimension_numbers<[1], [0], [0], [1], [0, 0, 1, 1], [], []>} : vector<16x32xbf16>, vector<32x8xbf16>, vector<16x8xf32> -> vector<16x8xf32>
      %42 = vector.extract_strided_slice %41 {offsets = [0, 0], sizes = [8, 8], strides = [1, 1]} : vector<16x8xf32> to vector<8x8xf32>
      %43 = vector.extract_strided_slice %41 {offsets = [8, 0], sizes = [8, 8], strides = [1, 1]} : vector<16x8xf32> to vector<8x8xf32>
      %44 = vector.extract_strided_slice %42 {offsets = [0, 0], sizes = [8, 7], strides = [1, 1]} : vector<8x8xf32> to vector<8x7xf32>
      %45 = vector.extract_strided_slice %43 {offsets = [0, 1], sizes = [8, 7], strides = [1, 1]} : vector<8x8xf32> to vector<8x7xf32>
      %46 = arith.addf %44, %45 : vector<8x7xf32>
      %47 = arith.truncf %46 : vector<8x7xf32> to vector<8x7xbf16>
      %c0_21 = arith.constant 0 : index
      %48 = arith.index_cast %17 : i32 to index
      %c0_22 = arith.constant 0 : index
      %c0_23 = arith.constant 0 : index
      %49 = vector.load %arg6[%c0_21, %48, %c0_22, %c0_23] : memref<1x7x8x7xbf16, #tpu.memory_space<vmem>>, vector<1x1x8x7xbf16>
      %50 = vector.shape_cast %49 : vector<1x1x8x7xbf16> to vector<8x7xbf16>
      %51 = vector.shape_cast %47 : vector<8x7xbf16> to vector<1x1x8x7xbf16>
      tpu.vector_store %arg6[%c0_21, %48, %c0_22, %c0_23], %51 {strides = array<i32>} : memref<1x7x8x7xbf16, #tpu.memory_space<vmem>>, vector<1x1x8x7xbf16>,
      %c0_24 = arith.constant 0 : index
      %c0_25 = arith.constant 0 : index
      %52 = vector.load %arg7[%c0_24, %c0_25] : memref<8x7xf32, #tpu.memory_space<vmem>>, vector<8x7xf32>
      %53 = arith.addf %52, %46 : vector<8x7xf32>
      %c0_26 = arith.constant 0 : index
      %c0_27 = arith.constant 0 : index
      %54 = vector.load %arg7[%c0_26, %c0_27] : memref<8x7xf32, #tpu.memory_space<vmem>>, vector<8x7xf32>
      tpu.vector_store %arg7[%c0_26, %c0_27], %53 {strides = array<i32>} : memref<8x7xf32, #tpu.memory_space<vmem>>, vector<8x7xf32>,
      %c0_28 = arith.constant 0 : index
      %c0_29 = arith.constant 0 : index
      %55 = vector.load %arg8[%c0_28, %c0_29] : memref<8x7xf32, #tpu.memory_space<vmem>>, vector<8x7xf32>
      %56 = arith.mulf %46, %46 : vector<8x7xf32>
      %57 = arith.addf %55, %56 : vector<8x7xf32>
      %c0_30 = arith.constant 0 : index
      %c0_31 = arith.constant 0 : index
      %58 = vector.load %arg8[%c0_30, %c0_31] : memref<8x7xf32, #tpu.memory_space<vmem>>, vector<8x7xf32>
      tpu.vector_store %arg8[%c0_30, %c0_31], %57 {strides = array<i32>} : memref<8x7xf32, #tpu.memory_space<vmem>>, vector<8x7xf32>,
    } else {
    }
    %c4_i32 = arith.constant 4 : i32
    %21 = arith.addi %4, %c4_i32 : i32
    %c7_i32_11 = arith.constant 7 : i32
    %22 = arith.cmpi slt, %21, %c7_i32_11 : i32
    %23 = arith.extui %22 : i1 to i32
    %c0_i32_12 = arith.constant 0 : i32
    %24 = arith.cmpi ne, %23, %c0_i32_12 : i32
    scf.if %24 {
      %c16_i32 = arith.constant 16 : i32
      %36 = arith.muli %21, %c16_i32 : i32
      %37 = tpu.assume_multiple %36, 16 : i32
      %c0_19 = arith.constant 0 : index
      %38 = arith.index_cast %37 : i32 to index
      %c0_20 = arith.constant 0 : index
      %39 = vector.load %arg2[%c0_19, %38, %c0_20] : memref<1x128x8xbf16, #tpu.memory_space<vmem>>, vector<1x32x8xbf16>
      %40 = vector.shape_cast %39 : vector<1x32x8xbf16> to vector<32x8xbf16>
      %cst = arith.constant dense<0.000000e+00> : vector<16x8xf32>
      %41 = tpu.matmul %3, %40, %cst {dimension_numbers = #tpu.dot_dimension_numbers<[1], [0], [0], [1], [0, 0, 1, 1], [], []>} : vector<16x32xbf16>, vector<32x8xbf16>, vector<16x8xf32> -> vector<16x8xf32>
      %42 = vector.extract_strided_slice %41 {offsets = [0, 0], sizes = [8, 8], strides = [1, 1]} : vector<16x8xf32> to vector<8x8xf32>
      %43 = vector.extract_strided_slice %41 {offsets = [8, 0], sizes = [8, 8], strides = [1, 1]} : vector<16x8xf32> to vector<8x8xf32>
      %44 = vector.extract_strided_slice %42 {offsets = [0, 0], sizes = [8, 7], strides = [1, 1]} : vector<8x8xf32> to vector<8x7xf32>
      %45 = vector.extract_strided_slice %43 {offsets = [0, 1], sizes = [8, 7], strides = [1, 1]} : vector<8x8xf32> to vector<8x7xf32>
      %46 = arith.addf %44, %45 : vector<8x7xf32>
      %47 = arith.truncf %46 : vector<8x7xf32> to vector<8x7xbf16>
      %c0_21 = arith.constant 0 : index
      %48 = arith.index_cast %21 : i32 to index
      %c0_22 = arith.constant 0 : index
      %c0_23 = arith.constant 0 : index
      %49 = vector.load %arg6[%c0_21, %48, %c0_22, %c0_23] : memref<1x7x8x7xbf16, #tpu.memory_space<vmem>>, vector<1x1x8x7xbf16>
      %50 = vector.shape_cast %49 : vector<1x1x8x7xbf16> to vector<8x7xbf16>
      %51 = vector.shape_cast %47 : vector<8x7xbf16> to vector<1x1x8x7xbf16>
      tpu.vector_store %arg6[%c0_21, %48, %c0_22, %c0_23], %51 {strides = array<i32>} : memref<1x7x8x7xbf16, #tpu.memory_space<vmem>>, vector<1x1x8x7xbf16>,
      %c0_24 = arith.constant 0 : index
      %c0_25 = arith.constant 0 : index
      %52 = vector.load %arg7[%c0_24, %c0_25] : memref<8x7xf32, #tpu.memory_space<vmem>>, vector<8x7xf32>
      %53 = arith.addf %52, %46 : vector<8x7xf32>
      %c0_26 = arith.constant 0 : index
      %c0_27 = arith.constant 0 : index
      %54 = vector.load %arg7[%c0_26, %c0_27] : memref<8x7xf32, #tpu.memory_space<vmem>>, vector<8x7xf32>
      tpu.vector_store %arg7[%c0_26, %c0_27], %53 {strides = array<i32>} : memref<8x7xf32, #tpu.memory_space<vmem>>, vector<8x7xf32>,
      %c0_28 = arith.constant 0 : index
      %c0_29 = arith.constant 0 : index
      %55 = vector.load %arg8[%c0_28, %c0_29] : memref<8x7xf32, #tpu.memory_space<vmem>>, vector<8x7xf32>
      %56 = arith.mulf %46, %46 : vector<8x7xf32>
      %57 = arith.addf %55, %56 : vector<8x7xf32>
      %c0_30 = arith.constant 0 : index
      %c0_31 = arith.constant 0 : index
      %58 = vector.load %arg8[%c0_30, %c0_31] : memref<8x7xf32, #tpu.memory_space<vmem>>, vector<8x7xf32>
      tpu.vector_store %arg8[%c0_30, %c0_31], %57 {strides = array<i32>} : memref<8x7xf32, #tpu.memory_space<vmem>>, vector<8x7xf32>,
    } else {
    }
    %c5_i32 = arith.constant 5 : i32
    %25 = arith.addi %4, %c5_i32 : i32
    %c7_i32_13 = arith.constant 7 : i32
    %26 = arith.cmpi slt, %25, %c7_i32_13 : i32
    %27 = arith.extui %26 : i1 to i32
    %c0_i32_14 = arith.constant 0 : i32
    %28 = arith.cmpi ne, %27, %c0_i32_14 : i32
    scf.if %28 {
      %c16_i32 = arith.constant 16 : i32
      %36 = arith.muli %25, %c16_i32 : i32
      %37 = tpu.assume_multiple %36, 16 : i32
      %c0_19 = arith.constant 0 : index
      %38 = arith.index_cast %37 : i32 to index
      %c0_20 = arith.constant 0 : index
      %39 = vector.load %arg2[%c0_19, %38, %c0_20] : memref<1x128x8xbf16, #tpu.memory_space<vmem>>, vector<1x32x8xbf16>
      %40 = vector.shape_cast %39 : vector<1x32x8xbf16> to vector<32x8xbf16>
      %cst = arith.constant dense<0.000000e+00> : vector<16x8xf32>
      %41 = tpu.matmul %3, %40, %cst {dimension_numbers = #tpu.dot_dimension_numbers<[1], [0], [0], [1], [0, 0, 1, 1], [], []>} : vector<16x32xbf16>, vector<32x8xbf16>, vector<16x8xf32> -> vector<16x8xf32>
      %42 = vector.extract_strided_slice %41 {offsets = [0, 0], sizes = [8, 8], strides = [1, 1]} : vector<16x8xf32> to vector<8x8xf32>
      %43 = vector.extract_strided_slice %41 {offsets = [8, 0], sizes = [8, 8], strides = [1, 1]} : vector<16x8xf32> to vector<8x8xf32>
      %44 = vector.extract_strided_slice %42 {offsets = [0, 0], sizes = [8, 7], strides = [1, 1]} : vector<8x8xf32> to vector<8x7xf32>
      %45 = vector.extract_strided_slice %43 {offsets = [0, 1], sizes = [8, 7], strides = [1, 1]} : vector<8x8xf32> to vector<8x7xf32>
      %46 = arith.addf %44, %45 : vector<8x7xf32>
      %47 = arith.truncf %46 : vector<8x7xf32> to vector<8x7xbf16>
      %c0_21 = arith.constant 0 : index
      %48 = arith.index_cast %25 : i32 to index
      %c0_22 = arith.constant 0 : index
      %c0_23 = arith.constant 0 : index
      %49 = vector.load %arg6[%c0_21, %48, %c0_22, %c0_23] : memref<1x7x8x7xbf16, #tpu.memory_space<vmem>>, vector<1x1x8x7xbf16>
      %50 = vector.shape_cast %49 : vector<1x1x8x7xbf16> to vector<8x7xbf16>
      %51 = vector.shape_cast %47 : vector<8x7xbf16> to vector<1x1x8x7xbf16>
      tpu.vector_store %arg6[%c0_21, %48, %c0_22, %c0_23], %51 {strides = array<i32>} : memref<1x7x8x7xbf16, #tpu.memory_space<vmem>>, vector<1x1x8x7xbf16>,
      %c0_24 = arith.constant 0 : index
      %c0_25 = arith.constant 0 : index
      %52 = vector.load %arg7[%c0_24, %c0_25] : memref<8x7xf32, #tpu.memory_space<vmem>>, vector<8x7xf32>
      %53 = arith.addf %52, %46 : vector<8x7xf32>
      %c0_26 = arith.constant 0 : index
      %c0_27 = arith.constant 0 : index
      %54 = vector.load %arg7[%c0_26, %c0_27] : memref<8x7xf32, #tpu.memory_space<vmem>>, vector<8x7xf32>
      tpu.vector_store %arg7[%c0_26, %c0_27], %53 {strides = array<i32>} : memref<8x7xf32, #tpu.memory_space<vmem>>, vector<8x7xf32>,
      %c0_28 = arith.constant 0 : index
      %c0_29 = arith.constant 0 : index
      %55 = vector.load %arg8[%c0_28, %c0_29] : memref<8x7xf32, #tpu.memory_space<vmem>>, vector<8x7xf32>
      %56 = arith.mulf %46, %46 : vector<8x7xf32>
      %57 = arith.addf %55, %56 : vector<8x7xf32>
      %c0_30 = arith.constant 0 : index
      %c0_31 = arith.constant 0 : index
      %58 = vector.load %arg8[%c0_30, %c0_31] : memref<8x7xf32, #tpu.memory_space<vmem>>, vector<8x7xf32>
      tpu.vector_store %arg8[%c0_30, %c0_31], %57 {strides = array<i32>} : memref<8x7xf32, #tpu.memory_space<vmem>>, vector<8x7xf32>,
    } else {
    }
    %c6_i32 = arith.constant 6 : i32
    %29 = arith.addi %4, %c6_i32 : i32
    %c7_i32_15 = arith.constant 7 : i32
    %30 = arith.cmpi slt, %29, %c7_i32_15 : i32
    %31 = arith.extui %30 : i1 to i32
    %c0_i32_16 = arith.constant 0 : i32
    %32 = arith.cmpi ne, %31, %c0_i32_16 : i32
    scf.if %32 {
      %c16_i32 = arith.constant 16 : i32
      %36 = arith.muli %29, %c16_i32 : i32
      %37 = tpu.assume_multiple %36, 16 : i32
      %c0_19 = arith.constant 0 : index
      %38 = arith.index_cast %37 : i32 to index
      %c0_20 = arith.constant 0 : index
      %39 = vector.load %arg2[%c0_19, %38, %c0_20] : memref<1x128x8xbf16, #tpu.memory_space<vmem>>, vector<1x32x8xbf16>
      %40 = vector.shape_cast %39 : vector<1x32x8xbf16> to vector<32x8xbf16>
      %cst = arith.constant dense<0.000000e+00> : vector<16x8xf32>
      %41 = tpu.matmul %3, %40, %cst {dimension_numbers = #tpu.dot_dimension_numbers<[1], [0], [0], [1], [0, 0, 1, 1], [], []>} : vector<16x32xbf16>, vector<32x8xbf16>, vector<16x8xf32> -> vector<16x8xf32>
      %42 = vector.extract_strided_slice %41 {offsets = [0, 0], sizes = [8, 8], strides = [1, 1]} : vector<16x8xf32> to vector<8x8xf32>
      %43 = vector.extract_strided_slice %41 {offsets = [8, 0], sizes = [8, 8], strides = [1, 1]} : vector<16x8xf32> to vector<8x8xf32>
      %44 = vector.extract_strided_slice %42 {offsets = [0, 0], sizes = [8, 7], strides = [1, 1]} : vector<8x8xf32> to vector<8x7xf32>
      %45 = vector.extract_strided_slice %43 {offsets = [0, 1], sizes = [8, 7], strides = [1, 1]} : vector<8x8xf32> to vector<8x7xf32>
      %46 = arith.addf %44, %45 : vector<8x7xf32>
      %47 = arith.truncf %46 : vector<8x7xf32> to vector<8x7xbf16>
      %c0_21 = arith.constant 0 : index
      %48 = arith.index_cast %29 : i32 to index
      %c0_22 = arith.constant 0 : index
      %c0_23 = arith.constant 0 : index
      %49 = vector.load %arg6[%c0_21, %48, %c0_22, %c0_23] : memref<1x7x8x7xbf16, #tpu.memory_space<vmem>>, vector<1x1x8x7xbf16>
      %50 = vector.shape_cast %49 : vector<1x1x8x7xbf16> to vector<8x7xbf16>
      %51 = vector.shape_cast %47 : vector<8x7xbf16> to vector<1x1x8x7xbf16>
      tpu.vector_store %arg6[%c0_21, %48, %c0_22, %c0_23], %51 {strides = array<i32>} : memref<1x7x8x7xbf16, #tpu.memory_space<vmem>>, vector<1x1x8x7xbf16>,
      %c0_24 = arith.constant 0 : index
      %c0_25 = arith.constant 0 : index
      %52 = vector.load %arg7[%c0_24, %c0_25] : memref<8x7xf32, #tpu.memory_space<vmem>>, vector<8x7xf32>
      %53 = arith.addf %52, %46 : vector<8x7xf32>
      %c0_26 = arith.constant 0 : index
      %c0_27 = arith.constant 0 : index
      %54 = vector.load %arg7[%c0_26, %c0_27] : memref<8x7xf32, #tpu.memory_space<vmem>>, vector<8x7xf32>
      tpu.vector_store %arg7[%c0_26, %c0_27], %53 {strides = array<i32>} : memref<8x7xf32, #tpu.memory_space<vmem>>, vector<8x7xf32>,
      %c0_28 = arith.constant 0 : index
      %c0_29 = arith.constant 0 : index
      %55 = vector.load %arg8[%c0_28, %c0_29] : memref<8x7xf32, #tpu.memory_space<vmem>>, vector<8x7xf32>
      %56 = arith.mulf %46, %46 : vector<8x7xf32>
      %57 = arith.addf %55, %56 : vector<8x7xf32>
      %c0_30 = arith.constant 0 : index
      %c0_31 = arith.constant 0 : index
      %58 = vector.load %arg8[%c0_30, %c0_31] : memref<8x7xf32, #tpu.memory_space<vmem>>, vector<8x7xf32>
      tpu.vector_store %arg8[%c0_30, %c0_31], %57 {strides = array<i32>} : memref<8x7xf32, #tpu.memory_space<vmem>>, vector<8x7xf32>,
    } else {
    }
    %c0_i32_17 = arith.constant 0 : i32
    %33 = arith.cmpi eq, %arg1, %c0_i32_17 : i32
    %34 = arith.extui %33 : i1 to i32
    %c0_i32_18 = arith.constant 0 : i32
    %35 = arith.cmpi ne, %34, %c0_i32_18 : i32
    scf.if %35 {
      %c0_19 = arith.constant 0 : index
      %c0_20 = arith.constant 0 : index
      %36 = vector.load %arg7[%c0_19, %c0_20] : memref<8x7xf32, #tpu.memory_space<vmem>>, vector<8x7xf32>
      %cst = arith.constant dense<0.000000e+00> : vector<8xf32>
      %37 = vector.multi_reduction <add>, %36, %cst [1] : vector<8x7xf32> to vector<8xf32>
      %38 = vector.shape_cast %37 : vector<8xf32> to vector<8x1xf32>
      %cst_21 = arith.constant 0.0204081628 : f32
      %39 = vector.broadcast %cst_21 : f32 to vector<8x1xf32>
      %40 = arith.mulf %38, %39 : vector<8x1xf32>
      %c0_22 = arith.constant 0 : index
      %c0_23 = arith.constant 0 : index
      %41 = vector.load %arg8[%c0_22, %c0_23] : memref<8x7xf32, #tpu.memory_space<vmem>>, vector<8x7xf32>
      %cst_24 = arith.constant dense<0.000000e+00> : vector<8xf32>
      %42 = vector.multi_reduction <add>, %41, %cst_24 [1] : vector<8x7xf32> to vector<8xf32>
      %43 = vector.shape_cast %42 : vector<8xf32> to vector<8x1xf32>
      %cst_25 = arith.constant 0.0204081628 : f32
      %44 = vector.broadcast %cst_25 : f32 to vector<8x1xf32>
      %45 = arith.mulf %43, %44 : vector<8x1xf32>
      %46 = arith.mulf %40, %40 : vector<8x1xf32>
      %47 = arith.subf %45, %46 : vector<8x1xf32>
      %cst_26 = arith.constant 0.000000e+00 : f32
      %48 = vector.broadcast %cst_26 : f32 to vector<8x1xf32>
      %49 = arith.maximumf %47, %48 : vector<8x1xf32>
      %cst_27 = arith.constant 9.99999974E-6 : f32
      %50 = vector.broadcast %cst_27 : f32 to vector<8x1xf32>
      %51 = arith.addf %49, %50 : vector<8x1xf32>
      %52 = math.rsqrt %51 : vector<8x1xf32>
      %c0_28 = arith.constant 0 : index
      %c0_29 = arith.constant 0 : index
      %53 = vector.load %arg4[%c0_28, %c0_29] : memref<8x1xf32, #tpu.memory_space<vmem>>, vector<8x1xf32>
      %54 = arith.mulf %53, %52 : vector<8x1xf32>
      %c0_30 = arith.constant 0 : index
      %c0_31 = arith.constant 0 : index
      %55 = vector.load %arg5[%c0_30, %c0_31] : memref<8x1xf32, #tpu.memory_space<vmem>>, vector<8x1xf32>
      %56 = arith.mulf %40, %54 : vector<8x1xf32>
      %57 = arith.subf %55, %56 : vector<8x1xf32>
      %c0_32 = arith.constant 0 : index
      %c0_33 = arith.constant 0 : index
      %c0_34 = arith.constant 0 : index
      %c0_35 = arith.constant 0 : index
      %58 = vector.load %arg6[%c0_32, %c0_33, %c0_34, %c0_35] : memref<1x7x8x7xbf16, #tpu.memory_space<vmem>>, vector<1x7x8x7xbf16>
      %59 = vector.shape_cast %58 : vector<1x7x8x7xbf16> to vector<7x8x7xbf16>
      %60 = arith.extf %59 : vector<7x8x7xbf16> to vector<7x8x7xf32>
      %61 = vector.shape_cast %54 : vector<8x1xf32> to vector<1x8x1xf32>
      %62 = vector.broadcast %61 : vector<1x8x1xf32> to vector<7x8x7xf32>
      %63 = arith.mulf %60, %62 : vector<7x8x7xf32>
      %64 = vector.shape_cast %57 : vector<8x1xf32> to vector<1x8x1xf32>
      %65 = vector.broadcast %64 : vector<1x8x1xf32> to vector<7x8x7xf32>
      %66 = arith.addf %63, %65 : vector<7x8x7xf32>
      %cst_36 = arith.constant 0.000000e+00 : f32
      %67 = vector.broadcast %cst_36 : f32 to vector<7x8x7xf32>
      %68 = arith.cmpf oge, %66, %67 : vector<7x8x7xf32>
      %cst_37 = arith.constant 2.000000e-01 : f32
      %69 = vector.broadcast %cst_37 : f32 to vector<7x8x7xf32>
      %70 = arith.mulf %69, %66 : vector<7x8x7xf32>
      %71 = arith.select %68, %66, %70 : vector<7x8x7xi1>, vector<7x8x7xf32>
      %72 = arith.truncf %71 : vector<7x8x7xf32> to vector<7x8x7xbf16>
      %c0_38 = arith.constant 0 : index
      %c0_39 = arith.constant 0 : index
      %c0_40 = arith.constant 0 : index
      %c0_41 = arith.constant 0 : index
      %73 = vector.load %arg6[%c0_38, %c0_39, %c0_40, %c0_41] : memref<1x7x8x7xbf16, #tpu.memory_space<vmem>>, vector<1x7x8x7xbf16>
      %74 = vector.shape_cast %73 : vector<1x7x8x7xbf16> to vector<7x8x7xbf16>
      %75 = vector.shape_cast %72 : vector<7x8x7xbf16> to vector<1x7x8x7xbf16>
      tpu.vector_store %arg6[%c0_38, %c0_39, %c0_40, %c0_41], %75 {strides = array<i32>} : memref<1x7x8x7xbf16, #tpu.memory_space<vmem>>, vector<1x7x8x7xbf16>,
    } else {
    }
    return
  }
  func.func @transform_0(%arg0: i32, %arg1: i32) -> (i32, i32, i32) {
    %c0_i32 = arith.constant 0 : i32
    %c0_i32_0 = arith.constant 0 : i32
    %c0_i32_1 = arith.constant 0 : i32
    return %arg0, %c0_i32, %c0_i32_0 : i32, i32, i32
  }
  func.func @transform_1(%arg0: i32, %arg1: i32) -> (i32, i32) {
    %c0_i32 = arith.constant 0 : i32
    %c0_i32_0 = arith.constant 0 : i32
    %c0_i32_1 = arith.constant 0 : i32
    return %c0_i32, %c0_i32_0 : i32, i32
  }
  func.func @transform_2(%arg0: i32, %arg1: i32) -> (i32, i32) {
    %c0_i32 = arith.constant 0 : i32
    %c0_i32_0 = arith.constant 0 : i32
    %c0_i32_1 = arith.constant 0 : i32
    return %c0_i32, %c0_i32_0 : i32, i32
  }
  func.func @transform_3(%arg0: i32, %arg1: i32) -> (i32, i32) {
    %c0_i32 = arith.constant 0 : i32
    %c0_i32_0 = arith.constant 0 : i32
    %c0_i32_1 = arith.constant 0 : i32
    return %c0_i32, %c0_i32_0 : i32, i32
  }
  func.func @transform_4(%arg0: i32, %arg1: i32) -> (i32, i32, i32, i32) {
    %c0_i32 = arith.constant 0 : i32
    %c0_i32_0 = arith.constant 0 : i32
    %c0_i32_1 = arith.constant 0 : i32
    %c0_i32_2 = arith.constant 0 : i32
    return %arg0, %c0_i32, %c0_i32_0, %c0_i32_1 : i32, i32, i32, i32
  }
}

</mosaic_0001>

<bundles_post_ra>
// kernel: cnn_block_forward.1
= control target key start
LH: loop header
LB: loop body
LE: loop exit
PB: predicated region body
PF: predicated region fallthrough
CT: control target
= control target key end

     0   :  { %s1149_s15 = smov 0   ;;  %s1151_s16 = smov 0   ;;  %s1288_s0 = inlined_call_operand.vmem [shape: bf16[2,128,8], index: 0, kind: input, shape index: {}]   ;;  %s1289_s1 = inlined_call_operand.vmem [shape: bf16[16,32], index: 1, kind: input, shape index: {}]   ;;  %s1290_s2 = inlined_call_operand.vmem [shape: f32[8,1], index: 2, kind: input, shape index: {}]   ;;  %s1291_s3 = inlined_call_operand.vmem [shape: f32[8,1], index: 3, kind: input, shape index: {}]   ;;  %s1292_s4 = inlined_call_operand.vmem [shape: bf16[2,7,8,7], index: 4, kind: output, shape index: {}]  }
   0x1   :  { %s1153_s17 = smov 0  }
   0x2 LB: > { %s26_s18 = sadd.s32 1, %s1115_s16  ;;  %p903_p0 = scmp.ge.s32.totalorder %s1119_s17, 1  ;;  %s1119_s17 = sphi %s1153_s17, %s14_s17   ;;  %s1115_s16 = sphi %s1151_s16, %s1294_s16   ;;  %s1111_s15 = sphi %s1149_s15, %s1293_s15  }
   0x3   : > { %p28_p1 = scmp.ge.s32.totalorder %s26_s18, 2  ;;  %p174_p2 = scmp.lt.s32.totalorder %s1119_s17, 3 }
   0x5   : > { %s1296_s18 = smov (%p28_p1, %s26_s18), 0  ;;  %p175_p3 = pnand %p903_p0, %p174_p2 }
   0x6   : > { %p200_p4 = scmp.lt.s32.totalorder (!%p175_p3), %s1111_s15, 1  ;;  %s1121_s11 = smov (!%p175_p3), 127  }
   0x7   : > { %178 = sbr.rel (%p175_p3) target bundleno = 630 (0x276), region = 36 }
   0xc   : > { %s1298_s15 = smov (!%p200_p4, %s1111_s15), 1  ;;  %v1037_v10 = vld [vmem:[%s1289_s1] sm:$0xff]  ;;  %vm251_vm0 = vcmask 261120   ;;  %vm215_vm1 = vcmask 56320   ;;  %v1122_v35 = vmov 0.0   ;;  %vm277_vm2 = vcmask 52224  }
   0xd   : > { %s1030_s19 = sshll.u32 %s1298_s15, 6  ;;  %v1035_v11 = vld [vmem:[%s1289_s1] sm:$0xff]  ;;  %216 = vst.msk [vmem:[#allocation2] sm:$0xff] %vm215_vm1, %v1122_v35  ;;  %s1066_s12 = smul.u32 28, %s1298_s15 }
   0xe   : > { %s1173_s22 = scalar_lea.vmem %s1288_s0, %s1030_s19  ;;  %v1036_v12 = vld [vmem:[%s1289_s1] sm:$0xff]  ;;  %217 = vst.msk [vmem:[#allocation3] sm:$0xff] %vm215_vm1, %v1122_v35 }
   0xf   : > { %v1039_v0 = vld [vmem:[%s1173_s22 + $0x8] sm:$0xff]  ;;  %v1043_v1 = vld [vmem:[%s1173_s22 + $0x18] sm:$0xff]  ;;  %v1041_v2 = vld [vmem:[%s1173_s22 + $0x10] sm:$0xff]  ;;  %s1223_s19 = scalar_lea.vmem %s1292_s4, %s1066_s12 }
  0x10   : > { %261 = vmatpush.bf16.msra.mxu0 %v1039_v0  ;;  %395 = vmatpush.bf16.msra.mxu2 %v1043_v1  ;;  %v1038_v3 = vld [vmem:[%s1173_s22] sm:$0xff]  ;;  %v1042_v4 = vld [vmem:[%s1173_s22 + $0x10] sm:$0xff]  ;;  %v1040_v6 = vld [vmem:[%s1173_s22 + $0x8] sm:$0xff] }
  0x11   : > { %v1045_v5 = vld [vmem:[%s1173_s22 + $0x20] sm:$0xff]  ;;  %328 = vmatpush.bf16.msra.mxu1 %v1041_v2  ;;  %v1047_v7 = vld [vmem:[%s1173_s22 + $0x28] sm:$0xff]  ;;  %v1044_v8 = vld [vmem:[%s1173_s22 + $0x18] sm:$0xff] }
  0x12   : > { %462 = vmatpush.bf16.msra.mxu3 %v1045_v5  ;;  %v1051_v9 = vld [vmem:[%s1173_s22 + $0x38] sm:$0xff]  ;;  %v1034_v13 = vld [vmem:[%s1289_s1] sm:$0xff]  ;;  %v1050_v15 = vld [vmem:[%s1173_s22 + $0x30] sm:$0xff] }
  0x13   : > { %v1046_v14 = vld [vmem:[%s1173_s22 + $0x20] sm:$0xff]  ;;  %v1049_v16 = vld [vmem:[%s1173_s22 + $0x30] sm:$0xff]  ;;  %v1048_v17 = vld [vmem:[%s1173_s22 + $0x28] sm:$0xff] }
  0x14   : > { %262 = vmatpush.bf16.msra.mxu0 %v1038_v3  ;;  %396 = vmatpush.bf16.msra.mxu2 %v1042_v4  ;;  %v1033_v18 = vld [vmem:[%s1289_s1] sm:$0xff] }
  0x15   : > { %329 = vmatpush.bf16.msra.mxu1 %v1040_v6  ;;  %v1031_v19 = vld [vmem:[%s1289_s1] sm:$0xff]  ;;  %v283_v44 = vld [vmem:[#allocation3] sm:$0xff] }
  0x16   : > { %463 = vmatpush.bf16.msra.mxu3 %v1044_v8  ;;  %v1032_v20 = vld [vmem:[%s1289_s1] sm:$0xff] }
  0x17   : > { %919 = vmatmul.msk.bf16.vlgmr.msra.gmra.mxu0 %vm251_vm0, %v1037_v10  ;;  %954 = vmatmul.msk.bf16.vlgmr.msra.gmra.mxu2 %vm251_vm0, %v1035_v11  ;;  %v279_v39 = vld [vmem:[#allocation2] sm:$0xff] }
  0x18   : > { %529 = vmatpush.bf16.msrb.mxu0 %v1047_v7  ;;  %663 = vmatpush.bf16.msrb.mxu2 %v1051_v9 }
  0x19   : > { %936 = vmatmul.msk.bf16.vlgmr.msra.gmra.mxu1 %vm251_vm0, %v1036_v12  ;;  %972 = vmatmul.msk.bf16.vlgmr.msra.gmra.mxu3 %vm251_vm0, %v1034_v13 }
  0x1a   : > { %596 = vmatpush.bf16.msrb.mxu1 %v1049_v16 }
  0x1c   : > { %530 = vmatpush.bf16.msrb.mxu0 %v1046_v14  ;;  %664 = vmatpush.bf16.msrb.mxu2 %v1050_v15 }
  0x1e   : > { %597 = vmatpush.bf16.msrb.mxu1 %v1048_v17 }
  0x27   : > { %990 = vmatmul.msk.bf16.vlgmr.msrb.gmra.mxu0 %vm251_vm0, %v1033_v18  ;;  %1026 = vmatmul.msk.bf16.vlgmr.msrb.gmra.mxu2 %vm251_vm0, %v1031_v19 }
  0x29   : > { %1008 = vmatmul.msk.bf16.vlgmr.msrb.gmra.mxu1 %vm251_vm0, %v1032_v20 }
  0x94   : > { %v264_v21 = vpop.f32.mrf.mxu0 }
  0x96   : > { %v331_v22 = vpop.f32.mrf.mxu1 }
  0x9a   : > { %v398_v23 = vpop.f32.mrf.mxu2 }
  0x9c   : > { %v266_v24 = vpop.f32.mrf.mxu0  ;;  %v465_v25 = vpop.f32.mrf.mxu3 }
  0x9d   : > { %270 = vrot.lane.b32.xlu0 %v266_v24, %s1121_s11 }
  0x9e   : > { %v333_v26 = vpop.f32.mrf.mxu1 }
  0xa2   : > { %v400_v27 = vpop.f32.mrf.mxu2 }
  0xa3   : > { %404 = vrot.lane.b32.xlu1 %v400_v27, %s1121_s11 }
  0xa4   : > { %v532_v28 = vpop.f32.mrf.mxu0  ;;  %v467_v29 = vpop.f32.mrf.mxu3 }
  0xa5   : > { %337 = vrot.lane.b32.xlu0 %v333_v26, %s1121_s11 }
  0xa6   : > { %v599_v30 = vpop.f32.mrf.mxu1 }
  0xaa   : > { %v666_v31 = vpop.f32.mrf.mxu2 }
  0xab   : > { %471 = vrot.lane.b32.xlu1 %v467_v29, %s1121_s11 }
  0xac   : > { %v534_v32 = vpop.f32.mrf.mxu0 }
  0xad   : > { %538 = vrot.lane.b32.xlu2 %v534_v32, %s1121_s11  ;;  %v1123_v32 = vmov 0  }
  0xae   : > { %v601_v34 = vpop.f32.mrf.mxu1  ;;  %1094 = vset.pattern.permute.xlu0 %v1123_v32 }
  0xb2   : > { %v668_v33 = vpop.f32.mrf.mxu2 }
  0xb3   : > { %672 = vrot.lane.b32.xlu0 %v668_v33, %s1121_s11 }
  0xb5   : > { %605 = vrot.lane.b32.xlu2 %v601_v34, %s1121_s11 }
 0x107   : > { %v539_v36 = vpop.permute.xlu2 %538 }
 0x108   : > { %v541_v37 = vadd.f32 %v539_v36, %v532_v28 }
 0x10a   : > { %v542_v38 = vpack.c.bf16 %v541_v37, %v541_v37  ;;  %v552_v13 = vmul.f32 %v541_v37, %v541_v37 }
 0x10c   : > { %991 = vst.msk [vmem:[%s1223_s19 + $0x10] sm:$0xf] %vm277_vm2, %v542_v38 }
 0x10f   : > { %v271_v40 = vpop.permute.xlu0 %270  ;;  %v606_v41 = vpop.permute.xlu2 %605 }
 0x110   : > { %v273_v42 = vadd.f32 %v271_v40, %v264_v21  ;;  %v608_v43 = vadd.f32 %v606_v41, %v599_v30 }
 0x112   : > { %v274_v45 = vpack.c.bf16 %v273_v42, %v273_v42  ;;  %v280_v46 = vadd.f32 %v279_v39, %v273_v42  ;;  %v284_v47 = vmul.f32 %v273_v42, %v273_v42  ;;  %v609_v48 = vpack.c.bf16 %v608_v43, %v608_v43 }
 0x113   : > { %v619_v18 = vmul.f32 %v608_v43, %v608_v43 }
 0x114   : > { %278 = vst.msk [vmem:[%s1223_s19] sm:$0xf] %vm277_vm2, %v274_v45  ;;  %v285_v49 = vadd.f32 %v284_v47, %v283_v44  ;;  %v717_v47 = vld [vmem:[%s1290_s2] sm:$0xff] }
 0x115   : > { %282 = vst.msk [vmem:[#allocation2] sm:$0xff] %vm215_vm1, %v280_v46  ;;  %v405_v50 = vpop.permute.xlu1 %404 }
 0x116   : > { %286 = vst.msk [vmem:[#allocation3] sm:$0xff] %vm215_vm1, %v285_v49  ;;  %v407_v51 = vadd.f32 %v405_v50, %v398_v23 }
 0x117   : > { %1009 = vst.msk [vmem:[%s1223_s19 + $0x14] sm:$0xf] %vm277_vm2, %v609_v48  ;;  %v338_v52 = vpop.permute.xlu0 %337 }
 0x118   : > { %v408_v53 = vpack.c.bf16 %v407_v51, %v407_v51  ;;  %v340_v54 = vadd.f32 %v338_v52, %v331_v22  ;;  %v418_v1 = vmul.f32 %v407_v51, %v407_v51 }
 0x11a   : > { %955 = vst.msk [vmem:[%s1223_s19 + $0x8] sm:$0xf] %vm277_vm2, %v408_v53  ;;  %v341_v55 = vpack.c.bf16 %v340_v54, %v340_v54  ;;  %v351_v57 = vmul.f32 %v340_v54, %v340_v54 }
 0x11c   : > { %v346_v56 = vld [vmem:[#allocation2] sm:$0xff]  ;;  %937 = vst.msk [vmem:[%s1223_s19 + $0x4] sm:$0xf] %vm277_vm2, %v341_v55 }
 0x11d   : > { %v350_v58 = vld [vmem:[#allocation3] sm:$0xff]  ;;  %v347_v59 = vadd.f32 %v346_v56, %v340_v54  ;;  %v472_v60 = vpop.permute.xlu1 %471 }
 0x11e   : > { %v352_v61 = vadd.f32 %v351_v57, %v350_v58  ;;  %v474_v62 = vadd.f32 %v472_v60, %v465_v25  ;;  %v1065_v57 = vld [vmem:[%s1223_s19 + $0x10] sm:$0xff]  }
 0x11f   : > { %349 = vst.msk [vmem:[#allocation2] sm:$0xff] %vm215_vm1, %v347_v59 }
 0x120   : > { %353 = vst.msk [vmem:[#allocation3] sm:$0xff] %vm215_vm1, %v352_v61  ;;  %v475_v63 = vpack.c.bf16 %v474_v62, %v474_v62  ;;  %v485_v9 = vmul.f32 %v474_v62, %v474_v62 }
 0x122   : > { %973 = vst.msk [vmem:[%s1223_s19 + $0xc] sm:$0xf] %vm277_vm2, %v475_v63  ;;  %v1062_v63 = vunpack.c.l.bf16 %v1065_v57 }
 0x123   : > { %v1053_v54 = vld [vmem:[%s1223_s19] sm:$0xff]  }
 0x124   : > { %v1054_v58 = vunpack.c.l.bf16 %v1053_v54  ;;  %v1055_v59 = vunpack.c.h.bf16 %v1053_v54 }
 0x125   : > { %v673_v0 = vpop.permute.xlu0 %672 }
 0x126   : > { %v413_v2 = vld [vmem:[#allocation2] sm:$0xff]  ;;  %v675_v3 = vadd.f32 %v673_v0, %v666_v31  ;;  %v1063_v0 = vunpack.c.h.bf16 %v1065_v57 }
 0x127   : > { %v414_v4 = vadd.f32 %v413_v2, %v407_v51  ;;  %v417_v5 = vld [vmem:[#allocation3] sm:$0xff]  ;;  %v719_v51 = vld [vmem:[%s1291_s3] sm:$0xff] }
 0x128   : > { %v419_v6 = vadd.f32 %v418_v1, %v417_v5  ;;  %v676_v7 = vpack.c.bf16 %v675_v3, %v675_v3  ;;  %v686_v24 = vmul.f32 %v675_v3, %v675_v3 }
 0x129   : > { %416 = vst.msk [vmem:[#allocation2] sm:$0xff] %vm215_vm1, %v414_v4  ;;  %v1064_v55 = vld [vmem:[%s1223_s19 + $0x8] sm:$0xff]  }
 0x12a   : > { %420 = vst.msk [vmem:[#allocation3] sm:$0xff] %vm215_vm1, %v419_v6  ;;  %v1058_v60 = vunpack.c.l.bf16 %v1064_v55  ;;  %v1059_v61 = vunpack.c.h.bf16 %v1064_v55 }
 0x12b   : > { %1027 = vst.msk [vmem:[%s1223_s19 + $0x18] sm:$0xf] %vm277_vm2, %v676_v7 }
 0x130   : > { %v480_v8 = vld [vmem:[#allocation2] sm:$0xff] }
 0x131   : > { %v481_v10 = vadd.f32 %v480_v8, %v474_v62  ;;  %v484_v11 = vld [vmem:[#allocation3] sm:$0xff] }
 0x132   : > { %v486_v12 = vadd.f32 %v485_v9, %v484_v11  ;;  %v728_v56 = vld [vmem:[%s1223_s19 + $0x18] sm:$0xf] }
 0x133   : > { %483 = vst.msk [vmem:[#allocation2] sm:$0xff] %vm215_vm1, %v481_v10  ;;  %v735_v62 = vunpack.c.l.bf16 %v728_v56 }
 0x134   : > { %487 = vst.msk [vmem:[#allocation3] sm:$0xff] %vm215_vm1, %v486_v12 }
 0x13a   : > { %v547_v14 = vld [vmem:[#allocation2] sm:$0xff] }
 0x13b   : > { %v548_v15 = vadd.f32 %v547_v14, %v541_v37  ;;  %v551_v16 = vld [vmem:[#allocation3] sm:$0xff] }
 0x13c   : > { %v553_v17 = vadd.f32 %v552_v13, %v551_v16 }
 0x13d   : > { %550 = vst.msk [vmem:[#allocation2] sm:$0xff] %vm215_vm1, %v548_v15 }
 0x13e   : > { %554 = vst.msk [vmem:[#allocation3] sm:$0xff] %vm215_vm1, %v553_v17 }
 0x144   : > { %v614_v19 = vld [vmem:[#allocation2] sm:$0xff] }
 0x145   : > { %v615_v20 = vadd.f32 %v614_v19, %v608_v43  ;;  %v618_v21 = vld [vmem:[#allocation3] sm:$0xff] }
 0x146   : > { %v620_v22 = vadd.f32 %v619_v18, %v618_v21 }
 0x147   : > { %617 = vst.msk [vmem:[#allocation2] sm:$0xff] %vm215_vm1, %v615_v20 }
 0x148   : > { %621 = vst.msk [vmem:[#allocation3] sm:$0xff] %vm215_vm1, %v620_v22 }
 0x14e   : > { %v681_v23 = vld [vmem:[#allocation2] sm:$0xff] }
 0x14f   : > { %v682_v25 = vadd.f32 %v681_v23, %v675_v3  ;;  %v685_v26 = vld [vmem:[#allocation3] sm:$0xff] }
 0x150   : > { %v687_v27 = vadd.f32 %v686_v24, %v685_v26 }
 0x151   : > { %684 = vst.msk [vmem:[#allocation2] sm:$0xff] %vm215_vm1, %v682_v25 }
 0x152   : > { %688 = vst.msk [vmem:[#allocation3] sm:$0xff] %vm215_vm1, %v687_v27 }
 0x158   : > { %v692_v28 = vld [vmem:[#allocation2] sm:$0xff] }
 0x159   : > { %v694_v29 = vsel %vm215_vm1, %v692_v28, 0.0  ;;  %v698_v30 = vld [vmem:[#allocation3] sm:$0xff] }
 0x15a   : > { %695 = vadd.xlane.f32.xlu1 %v694_v29  ;;  %v699_v31 = vsel %vm215_vm1, %v698_v30, 0.0 }
 0x15b   : > { %700 = vadd.xlane.f32.xlu2 %v699_v31 }
 0x1cd   : > { %v696_v33 = vpop.xlane.xlu1 %695 }
 0x1ce   : > { %v697_v34 = vmul.f32 0.020408163, %v696_v33  ;;  %v701_v35 = vpop.xlane.xlu2 %700 }
 0x1cf   : > { %v702_v36 = vmul.f32 0.020408163, %v701_v35 }
 0x1d0   : > { %v703_v37 = vmul.f32 %v697_v34, %v697_v34 }
 0x1d2   : > { %v704_v38 = vsub.f32 %v702_v36, %v703_v37 }
 0x1d4   : > { %v705_v39 = vmax.f32 %v704_v38, 0.0 }
 0x1d6   : > { %v706_v40 = vadd.f32 1e-05, %v705_v39 }
 0x1d8   : > { %1095 = vrsqrt.f32 %v706_v40  ;;  %vm713_vm4 = vweird.f32 %v706_v40 }
 0x1de   : > { %v1096_v41 = vpop.eup %1095 }
 0x1df   : > { %v708_v42 = vmul.f32 %v1096_v41, %v706_v40  ;;  %vm714_vm3 = vweird.f32 %v1096_v41 }
 0x1e0   : > { %vm715_vm5 = vmor %vm713_vm4, %vm714_vm3 }
 0x1e1   : > { %v709_v43 = vmul.f32 %v1096_v41, %v708_v42 }
 0x1e3   : > { %v710_v44 = vmul.f32 0.5, %v709_v43 }
 0x1e5   : > { %v711_v45 = vsub.f32 1.5, %v710_v44 }
 0x1e7   : > { %v712_v46 = vmul.f32 %v1096_v41, %v711_v45 }
 0x1e9   : > { %v716_v48 = vsel %vm715_vm5, %v1096_v41, %v712_v46 }
 0x1ea   : > { %v718_v49 = vmul.f32 %v717_v47, %v716_v48 }
 0x1ec   : > { %738 = vperm.xlu0 %1094, %v718_v49   ;;  %v720_v50 = vmul.f32 %v718_v49, %v697_v34 }
 0x1ee   : > { %v721_v52 = vsub.f32 %v719_v51, %v720_v50 }
 0x1f4   : > { %750 = vperm.xlu0 %1094, %v721_v52  }
 0x25e   : > { %v739_v53 = vpop.permute.xlu0 %738 }
 0x25f   : > { %v741_v1 = vmul.f32 %v1054_v58, %v739_v53  ;;  %v742_v2 = vmul.f32 %v1055_v59, %v739_v53  ;;  %v743_v3 = vmul.f32 %v1058_v60, %v739_v53  ;;  %v744_v4 = vmul.f32 %v1059_v61, %v739_v53 }
 0x260   : > { %v747_v5 = vmul.f32 %v739_v53, %v735_v62  ;;  %v745_v7 = vmul.f32 %v1062_v63, %v739_v53  ;;  %v746_v8 = vmul.f32 %v1063_v0, %v739_v53 }
 0x266   : > { %v751_v6 = vpop.permute.xlu0 %750 }
 0x267   : > { %v753_v9 = vadd.f32 %v751_v6, %v741_v1  ;;  %v754_v10 = vadd.f32 %v751_v6, %v742_v2  ;;  %v755_v11 = vadd.f32 %v751_v6, %v743_v3  ;;  %v756_v12 = vadd.f32 %v751_v6, %v744_v4 }
 0x268   : > { %v757_v13 = vadd.f32 %v751_v6, %v745_v7  ;;  %v758_v14 = vadd.f32 %v751_v6, %v746_v8  ;;  %v759_v15 = vadd.f32 %v751_v6, %v747_v5 }
 0x269   : > { %vm760_vm6 = vcmp.ge.f32.partialorder %v753_v9, 0.0  ;;  %vm761_vm7 = vcmp.ge.f32.partialorder %v754_v10, 0.0  ;;  %vm762_vm8 = vcmp.ge.f32.partialorder %v755_v11, 0.0  ;;  %vm763_vm9 = vcmp.ge.f32.partialorder %v756_v12, 0.0 }
 0x26a   : > { %vm764_vm10 = vcmp.ge.f32.partialorder %v757_v13, 0.0  ;;  %vm765_vm11 = vcmp.ge.f32.partialorder %v758_v14, 0.0  ;;  %vm766_vm12 = vcmp.ge.f32.partialorder %v759_v15, 0.0  ;;  %v767_v16 = vmul.f32 0.2, %v753_v9 }
 0x26b   : > { %v768_v17 = vmul.f32 0.2, %v754_v10  ;;  %v769_v18 = vmul.f32 0.2, %v755_v11  ;;  %v770_v19 = vmul.f32 0.2, %v756_v12 }
 0x26c   : > { %v771_v20 = vmul.f32 0.2, %v757_v13  ;;  %v772_v21 = vmul.f32 0.2, %v758_v14  ;;  %v773_v22 = vmul.f32 0.2, %v759_v15  ;;  %v774_v23 = vsel %vm760_vm6, %v753_v9, %v767_v16 }
 0x26d   : > { %v775_v24 = vsel %vm761_vm7, %v754_v10, %v768_v17  ;;  %v776_v25 = vsel %vm762_vm8, %v755_v11, %v769_v18  ;;  %v777_v26 = vsel %vm763_vm9, %v756_v12, %v770_v19  ;;  %v781_v27 = vpack.c.bf16 %v774_v23, %v774_v23 }
 0x26e   : > { %v778_v28 = vsel %vm764_vm10, %v757_v13, %v771_v20  ;;  %v779_v29 = vsel %vm765_vm11, %v758_v14, %v772_v21  ;;  %v780_v30 = vsel %vm766_vm12, %v759_v15, %v773_v22  ;;  %v782_v31 = vpack.c.bf16 %v775_v24, %v775_v24 }
 0x26f   : > { %v783_v32 = vpack.c.bf16 %v776_v25, %v776_v25  ;;  %v784_v33 = vpack.c.bf16 %v777_v26, %v777_v26  ;;  %v785_v34 = vpack.c.bf16 %v778_v28, %v778_v28  ;;  %789 = vst.msk [vmem:[%s1223_s19] sm:$0xf] %vm277_vm2, %v781_v27  ;;  %v786_v35 = vpack.c.bf16 %v779_v29, %v779_v29 }
 0x270   : > { %790 = vst.msk [vmem:[%s1223_s19 + $0x4] sm:$0xf] %vm277_vm2, %v782_v31  ;;  %v787_v36 = vpack.c.bf16 %v780_v30, %v780_v30 }
 0x271   : > { %791 = vst.msk [vmem:[%s1223_s19 + $0x8] sm:$0xf] %vm277_vm2, %v783_v32 }
 0x272   : > { %792 = vst.msk [vmem:[%s1223_s19 + $0xc] sm:$0xf] %vm277_vm2, %v784_v33 }
 0x273   : > { %793 = vst.msk [vmem:[%s1223_s19 + $0x10] sm:$0xf] %vm277_vm2, %v785_v34 }
 0x274   : > { %794 = vst.msk [vmem:[%s1223_s19 + $0x14] sm:$0xf] %vm277_vm2, %v786_v35 }
 0x275   : > { %795 = vst.msk [vmem:[%s1223_s19 + $0x18] sm:$0xf] %vm277_vm2, %v787_v36 }
 0x276 PF: > { %s14_s17 = sadd.s32 1, %s1119_s17   ;;  %s1293_s15 = smov %s1115_s16 }
 0x277   : > { %p11_p5 = scmp.ge.s32.totalorder %s14_s17, 4   ;;  %s1294_s16 = smov %s1296_s18 }
 0x279   :  { %13 = sbr.rel (!%p11_p5) target bundleno = 2 (0x2), region = 116 }

</bundles_post_ra>
